<compile_context>
chip_gen: v7x
topology: tpu7x:2x2x1
jax: 0.10.0
libtpu: 0.0.40
codegen_flags: <defaults>
</compile_context>

<pallas_src>
import jax
import jax.numpy as jnp
from jax.experimental import pallas as pl
from jax.experimental.pallas import tpu as pltpu


def _pose_tokenizer_kernel(x_ref, w_ref, b_ref, o_ref):
    # x_ref: (tb, D)     -- batch tile of the full pose vector
    # w_ref: (D, N*T)    -- fused block-structured weight (same block every step)
    # b_ref: (1, N*T)    -- fused bias
    # o_ref: (tb, N*T)   -- lane-dense output tile
    y = jnp.dot(x_ref[...], w_ref[...], preferred_element_type=jnp.float32)
    o_ref[...] = (y + b_ref[...]).astype(o_ref.dtype)


def pose_tokenizer_forward(x, w_big, bias, num_parts):
    """
    x:      [B, D]        float32
    w_big:  [D, N*T]      float32 (fused, zero-padded per-part weights, transposed)
    bias:   [1, N*T]      float32
    returns: [B, N, T]
    """
    B, D = x.shape
    _, NT = w_big.shape
    T = NT // num_parts

    # Batch tile: single block for small B; 128-row tiles when B allows it
    # (keeps the (8,128) block constraint satisfied and scales to real batches).
    tb = 128 if (B % 128 == 0) else B
    grid = (B // tb,)

    cost = pl.CostEstimate(
        flops=2 * B * D * NT,
        transcendentals=0,
        bytes_accessed=4 * (B * D + D * NT + NT + B * NT),
    )

    out_bnt = pl.pallas_call(
        _pose_tokenizer_kernel,
        out_shape=jax.ShapeDtypeStruct((B, NT), jnp.float32),
        grid_spec=pltpu.PrefetchScalarGridSpec(
            num_scalar_prefetch=0,
            grid=grid,
            in_specs=[
                pl.BlockSpec((tb, D), lambda i: (i, 0)),    # x: batch tile
                pl.BlockSpec((D, NT), lambda i: (0, 0)),    # fused weights
                pl.BlockSpec((1, NT), lambda i: (0, 0)),    # fused bias
            ],
            out_specs=pl.BlockSpec((tb, NT), lambda i: (i, 0)),
        ),
        compiler_params=pltpu.CompilerParams(
            dimension_semantics=("parallel",)),
        cost_estimate=cost,
    )(x, w_big, bias)

    # [B, N*T] -> [B, N, T] is a free (layout-preserving) reshape; no transpose.
    return out_bnt.reshape(B, num_parts, T)


def init_pose_tokenizer_params(key, part_dims, pose_token_dim):
    """Deterministic synthetic params.  Per-part Linear(d_i -> T) weights are
    packed (transposed) into a fused block-structured [D, N*T] tensor."""
    N = len(part_dims)
    D = int(sum(part_dims))
    T = pose_token_dim

    w_big = jnp.zeros((D, N * T), dtype=jnp.float32)
    bias = jnp.zeros((1, N * T), dtype=jnp.float32)

    start = 0
    for n, d in enumerate(part_dims):
        key, kw, kb = jax.random.split(key, 3)
        bound = 1.0 / jnp.sqrt(d)  # matches nn.Linear default init scale
        # torch stores weight as (T, d); forward does x @ W.T, so pack W.T = (d, T)
        w_n = jax.random.uniform(kw, (d, T), jnp.float32, -bound, bound)
        b_n = jax.random.uniform(kb, (T,), jnp.float32, -bound, bound)
        w_big = w_big.at[start:start + d, n * T:(n + 1) * T].set(w_n)
        bias = bias.at[0, n * T:(n + 1) * T].set(b_n)
        start += d

    return w_big, bias


def pose_tokenizer_reference(x, w_big, bias, part_dims, pose_token_dim):
    """Pure-JAX reference mirroring the PyTorch loop (for correctness check)."""
    T = pose_token_dim
    toks = []
    start = 0
    for n, d in enumerate(part_dims):
        xs = x[:, start:start + d]
        w_n = w_big[start:start + d, n * T:(n + 1) * T]
        b_n = bias[0, n * T:(n + 1) * T]
        toks.append(xs @ w_n + b_n)
        start += d
    return jnp.stack(toks, axis=1)


if __name__ == "__main__":
    part_dims = (6, 3, 9, 12)        # D = 30, N = 4 parts
    pose_token_dim = 32              # N*T = 128 -> lane-dense output
    B = 2
    D = int(sum(part_dims))

    key = jax.random.PRNGKey(0)
    key, kx = jax.random.split(key)
    x = jax.random.normal(kx, (B, D), dtype=jnp.float32)

    w_big, bias = init_pose_tokenizer_params(key, part_dims, pose_token_dim)

    out = pose_tokenizer_forward(x, w_big, bias, num_parts=len(part_dims))
    out = jax.block_until_ready(out)

    ref = pose_tokenizer_reference(x, w_big, bias, part_dims, pose_token_dim)
    assert out.shape == (B, len(part_dims), pose_token_dim), out.shape
    assert jnp.allclose(out, ref, atol=1e-5, rtol=1e-5), "mismatch vs reference"

    print("KERNEL_OK")
</pallas_src>

<mosaic_0001>
module attributes {stable_mosaic.version = 11 : i64} {
  func.func @_pose_tokenizer_kernel(%arg0: i32, %arg1: memref<2x30xf32, #tpu.memory_space<vmem>>, %arg2: memref<30x128xf32, #tpu.memory_space<vmem>>, %arg3: memref<1x128xf32, #tpu.memory_space<vmem>>, %arg4: memref<2x128xf32, #tpu.memory_space<vmem>>) attributes {dimension_semantics = [#tpu.dimension_semantics<parallel>], iteration_bounds = array<i64: 1>, scalar_prefetch = 0 : i64, scratch_operands = 0 : i64, tpu.core_type = #tpu.core_type<tc>, window_params = [{transform_indices = @transform_0, window_bounds = array<i64: 2, 30>}, {pipeline_mode = #tpu.pipeline_mode<synchronous>, transform_indices = @transform_1, window_bounds = array<i64: 30, 128>}, {pipeline_mode = #tpu.pipeline_mode<synchronous>, transform_indices = @transform_2, window_bounds = array<i64: 1, 128>}, {transform_indices = @transform_3, window_bounds = array<i64: 2, 128>}]} {
    %c0 = arith.constant 0 : index
    %c0_0 = arith.constant 0 : index
    %0 = vector.load %arg1[%c0, %c0_0] : memref<2x30xf32, #tpu.memory_space<vmem>>, vector<2x30xf32>
    %c0_1 = arith.constant 0 : index
    %c0_2 = arith.constant 0 : index
    %1 = vector.load %arg2[%c0_1, %c0_2] : memref<30x128xf32, #tpu.memory_space<vmem>>, vector<30x128xf32>
    %cst = arith.constant dense<0.000000e+00> : vector<2x128xf32>
    %2 = tpu.matmul %0, %1, %cst {dimension_numbers = #tpu.dot_dimension_numbers<[1], [0], [0], [1], [0, 0, 1, 1], [], []>} : vector<2x30xf32>, vector<30x128xf32>, vector<2x128xf32> -> vector<2x128xf32>
    %c0_3 = arith.constant 0 : index
    %c0_4 = arith.constant 0 : index
    %3 = vector.load %arg3[%c0_3, %c0_4] : memref<1x128xf32, #tpu.memory_space<vmem>>, vector<1x128xf32>
    %4 = vector.broadcast %3 : vector<1x128xf32> to vector<2x128xf32>
    %5 = arith.addf %2, %4 : vector<2x128xf32>
    %c0_5 = arith.constant 0 : index
    %c0_6 = arith.constant 0 : index
    %6 = vector.load %arg4[%c0_5, %c0_6] : memref<2x128xf32, #tpu.memory_space<vmem>>, vector<2x128xf32>
    tpu.vector_store %arg4[%c0_5, %c0_6], %5 {strides = array<i32>} : memref<2x128xf32, #tpu.memory_space<vmem>>, vector<2x128xf32>,
    return
  }
  func.func @transform_0(%arg0: i32) -> (i32, i32) {
    %c0_i32 = arith.constant 0 : i32
    %c0_i32_0 = arith.constant 0 : i32
    return %arg0, %c0_i32 : i32, i32
  }
  func.func @transform_1(%arg0: i32) -> (i32, i32) {
    %c0_i32 = arith.constant 0 : i32
    %c0_i32_0 = arith.constant 0 : i32
    %c0_i32_1 = arith.constant 0 : i32
    return %c0_i32, %c0_i32_0 : i32, i32
  }
  func.func @transform_2(%arg0: i32) -> (i32, i32) {
    %c0_i32 = arith.constant 0 : i32
    %c0_i32_0 = arith.constant 0 : i32
    %c0_i32_1 = arith.constant 0 : i32
    return %c0_i32, %c0_i32_0 : i32, i32
  }
  func.func @transform_3(%arg0: i32) -> (i32, i32) {
    %c0_i32 = arith.constant 0 : i32
    %c0_i32_0 = arith.constant 0 : i32
    return %arg0, %c0_i32 : i32, i32
  }
}

</mosaic_0001>

<bundles_post_ra>
// kernel: tpu_custom_call.1
= control target key start
LH: loop header
LB: loop body
LE: loop exit
PB: predicated region body
PF: predicated region fallthrough
CT: control target
= control target key end

     0   :  { %8 = vsyncpa [#allocation3], 0  ;;  %s330_s0 = inlined_call_operand.hbm [shape: f32[2,30], index: 0, kind: input, shape index: {}]   ;;  %s331_s1 = inlined_call_operand.hbm [shape: f32[30,128], index: 1, kind: input, shape index: {}]   ;;  %s332_s2 = inlined_call_operand.vmem [shape: f32[1,128], index: 2, kind: input, shape index: {}]   ;;  %s333_s3 = inlined_call_operand.hbm [shape: f32[2,128], index: 3, kind: output, shape index: {}]  }
   0x1   :  { %9 = vsyncpa [#allocation6], 0 }
   0x2   :  { %10 = vsyncpa [#allocation4], 0  ;;  %s255_s12 = smov [#allocation2]   ;;  %s256_s14 = smov [#allocation5]  }
   0x3   :  { %s17_s13 = sshll.u32 %s255_s12, 4  ;;  %s26_s15 = sshll.u32 %s256_s14, 4  ;;  %s18_s13 = int_to_ptr.vmem [resolvable:$true] %s17_s13  ;;  %s284_s15 = int_to_ptr.vmem [resolvable:$true] %s26_s15 }
   0x4   :  { %s183_s18 = scalar_lea.hbm %s330_s0, 32 }
   0x5   :  { %p184_p0 = scmp.ne.s32.totalorder %s330_s0, %s183_s18  ;;  %p187_p1 = scmp.lt.u32.totalorder %s183_s18, %s330_s0 }
   0x7   :  { %p189_p2 = pnand %p187_p1, %p184_p0 }
   0x9   :  { %192 = shalt.err (!%p189_p2)
}
   0xa   :  { %s193_s23 = scalar_lea.vmem %s18_s13, 32  ;;  %p198_p4 = scmp.lt.s32.totalorder %s18_s13, %s18_s13 }
   0xb   :  { %p194_p3 = scmp.ne.s32.totalorder %s18_s13, %s193_s23  ;;  %p199_p5 = scmp.lt.s32.totalorder %s193_s23, %s193_s23 }
   0xd   :  { %p200_p6 = por %p199_p5, %p198_p4 }
   0xf   :  { %p201_p7 = pnand %p200_p6, %p194_p3 }
  0x11   :  { %204 = shalt.err (!%p201_p7)
}
  0x12   :  { %20 = dma.hbm_to_vmem [thread:$0]  %s330_s0, 32, %s18_s13, [#allocation3]  }
  0x13   :  { %s205_s28 = scalar_lea.hbm %s331_s1, 512 }
  0x14   :  { %p206_p8 = scmp.ne.s32.totalorder %s331_s1, %s205_s28  ;;  %p209_p9 = scmp.lt.u32.totalorder %s205_s28, %s331_s1 }
  0x16   :  { %p211_p10 = pnand %p209_p9, %p206_p8 }
  0x18   :  { %214 = shalt.err (!%p211_p10)
}
  0x19   :  { %s215_s6 = scalar_lea.vmem %s284_s15, 512  ;;  %p220_p12 = scmp.lt.s32.totalorder %s284_s15, %s284_s15 }
  0x1a   :  { %p216_p11 = scmp.ne.s32.totalorder %s284_s15, %s215_s6  ;;  %p221_p13 = scmp.lt.s32.totalorder %s215_s6, %s215_s6 }
  0x1c   :  { %p222_p0 = por %p221_p13, %p220_p12 }
  0x1e   :  { %p223_p1 = pnand %p222_p0, %p216_p11 }
  0x20   :  { %226 = shalt.err (!%p223_p1)
}
  0x21   :  { %s257_s0 = smov 128   ;;  %s258_s7 = smov 8  }
  0x22   :  { %32 = dma.hbm_to_vmem [thread:$0]  %s331_s1, 512, %s284_s15, [#allocation6], %s257_s0, %s257_s0, %s258_s7  }
  0x23   :  { %249 = dma.done.wait [#allocation3], 32  }
  0x24   :  { %250 = vsyncadd [#allocation3], 4294967264 }
  0x25   :  { %251 = dma.done.wait [#allocation6], 512  }
  0x26   :  { %252 = vsyncadd [#allocation6], 4294966784  ;;  %v259_v0 = vmov 0.0|0.0   ;;  %vm260_vm0 = vmmov 0   ;;  %v261_v1 = vmov 0.0   ;;  %v42_v2 = vld [vmem:[#allocation5] sm:$0xff] }
  0x27   :  { %167 = vmatprep.subr.bf16.mxu0 %v259_v0  ;;  %164 = vmatprep.mubr.msk.f32.mxu0 %vm260_vm0, %v261_v1  ;;  %v43_v3 = vld [vmem:[#allocation5 + $0x8] sm:$0xff]  ;;  %v44_v4 = vld [vmem:[#allocation5 + $0x10] sm:$0xff]  ;;  %v45_v6 = vld [vmem:[#allocation5 + $0x18] sm:$0x3f]  ;;  %vm57_vm1 = vcmask 1045504   ;;  %vm262_vm2 = vmmov 1  }
  0x28   :  { %v168_v5 = vpack.c.bf16 %v43_v3, %v42_v2  ;;  %v171_v7 = vpack.c.bf16 %v45_v6, %v44_v4  ;;  %vm172_vm3 = vmpackc.low %vm57_vm1, %vm262_vm2  ;;  %v41_v8 = vld [vmem:[#allocation2] sm:$0x3]  ;;  %vm53_vm4 = vcmask 244736   ;;  %s263_s11 = smov [#allocation7]  }
  0x29   :  { %v148_v9 = vld [vmem:[%s332_s2] ss:$0 sm:$0xff]  ;;  %s138_s12 = sshll.u32 %s263_s11, 4  ;;  %s139_s12 = int_to_ptr.vmem [resolvable:$true] %s138_s12 }
  0x2a   :  { %169 = vmatpush3.bf16.msra.mxu0 %v168_v5  ;;  %s227_s13 = scalar_lea.vmem %s139_s12, 32  ;;  %p232_p3 = scmp.lt.s32.totalorder %s139_s12, %s139_s12 }
  0x2b   :  { %170 = vmatprep.subr.bf16.mxu0 %v259_v0  ;;  %p228_p2 = scmp.ne.s32.totalorder %s139_s12, %s227_s13  ;;  %p233_p4 = scmp.lt.s32.totalorder %s227_s13, %s227_s13 }
  0x2d   :  { %p234_p5 = por %p233_p4, %p232_p3 }
  0x2e   :  { %173 = vmatpush3.bf16.msk.msra.mxu0 %vm172_vm3, %v171_v7 }
  0x2f   :  { %p235_p6 = pnand %p234_p5, %p228_p2 }
  0x31   :  { %165 = vmatmul.mubr.msk.f32.vlgmr.msra.gmra.mrb[0].mxu0 %vm53_vm4, %v41_v8 }
 0x104   :  { %v127_v10 = vpop.f32.mrb[0].mxu0 }
 0x105   :  { %v128_v11 = vadd.f32 %v148_v9, %v127_v10  ;;  %v166_v12 = vpop.f32.mrb[1].mxu0 }
 0x107   :  { %131 = vst [vmem:[#allocation7] sm:$0x3] %v128_v11 }
 0x108   :  { %238 = shalt.err (!%p235_p6)
}
 0x109   :  { %s239_s16 = scalar_lea.hbm %s333_s3, 32 }
 0x10a   :  { %p240_p7 = scmp.ne.s32.totalorder %s333_s3, %s239_s16  ;;  %p243_p8 = scmp.lt.u32.totalorder %s239_s16, %s333_s3 }
 0x10c   :  { %p245_p9 = pnand %p243_p8, %p240_p7 }
 0x10e   :  { %248 = shalt.err (!%p245_p9)
}
 0x10f   :  { %141 = dma.vmem_to_hbm [thread:$0]  %s139_s12, 32, %s333_s3, [#allocation4]  }
 0x110   :  { %253 = dma.done.wait [#allocation4], 32  }
 0x111   :  { %254 = vsyncadd [#allocation4], 4294967264 }
 0x112   :  { %145 = vsyncpa [#allocation3], 1 }
 0x113   :  { %146 = vsyncpa [#allocation6], 1 }
 0x114   :  { %147 = vsyncpa [#allocation4], 1 }

</bundles_post_ra>
